<compile_context>
chip_gen: v6e
topology: v6e:2x2x1
jax: 0.10.0
libtpu: 0.0.40
codegen_flags: <defaults>
</compile_context>

<pallas_src>
import functools

import jax
import jax.numpy as jnp
from jax.experimental import pallas as pl
from jax.experimental.pallas import tpu as pltpu

BN_EPS = 1e-5
H1 = 128   # fc1 output width
H2 = 64    # fc2 output width (padded to H2P lanes for the kernel)
H2P = 128  # lane-dense padded hidden-2 width


def _round_up(n, m):
    return ((n + m - 1) // m) * m


def _policy_kernel(x_ref, w1_ref, b1_ref, w2_ref, b2_ref, w4_ref, b4_ref, out_ref):
    # x / weights are bf16; every dot accumulates in f32 on the MXU.
    x = x_ref[...]

    # fc1 (+ folded BN1) + ReLU          (dropout: identity in eval mode)
    h1 = jnp.dot(x, w1_ref[...], preferred_element_type=jnp.float32) + b1_ref[...]
    h1 = jnp.maximum(h1, 0.0).astype(jnp.bfloat16)

    # fc2 (+ folded BN2, output padded to 128 lanes) + ReLU   (dropout: identity)
    h2 = jnp.dot(h1, w2_ref[...], preferred_element_type=jnp.float32) + b2_ref[...]
    h2 = jnp.maximum(h2, 0.0).astype(jnp.bfloat16)

    # fc4 (policy head, compact output)
    out = jnp.dot(h2, w4_ref[...], preferred_element_type=jnp.float32) + b4_ref[...]
    out_ref[...] = out.astype(out_ref.dtype)


def single_policy_net_forward(x, params, *, block_b=2048):
    """x: (B, dim). params: dict from init_params (BN already folded, bf16 weights)."""
    B, dim = x.shape

    w1, b1 = params["w1f"], params["b1f"]
    w2, b2 = params["w2f"], params["b2f"]
    w4, b4 = params["w4p"], params["b4f"]
    num_layers = w4.shape[1]               # static (from weight shape, not a tracer)

    # Feed x in bf16 (halves its HBM traffic); callers can pass bf16 directly.
    if x.dtype != jnp.bfloat16:
        x = x.astype(jnp.bfloat16)

    # Batch tile: multiple of 8 sublanes, at most block_b rows, and capped to ~B/2 so
    # moderate batches still produce >=2 grid steps (keeps v7x's 2nd TC busy).
    # No wrapper-side padding: the ragged final block is handled by Pallas.
    tb = max(8, min(block_b, _round_up(-(-B // 2), 8)))
    grid = (pl.cdiv(B, tb),)

    const = lambda i: (0, 0)  # weights stay VMEM-resident across all grid steps

    flops = 2 * B * (dim * H1 + H1 * H2P + H2P * num_layers)
    bytes_accessed = (
        2 * B * dim                                      # x (bf16)
        + 2 * (dim * H1 + H1 * H2P + H2P * num_layers)   # weights (bf16, fetched once)
        + 4 * (H1 + H2P + num_layers)                    # biases (f32)
        + 4 * B * num_layers                             # out (f32, compact)
    )

    out = pl.pallas_call(
        _policy_kernel,
        out_shape=jax.ShapeDtypeStruct((B, num_layers), jnp.float32),
        grid_spec=pltpu.PrefetchScalarGridSpec(
            num_scalar_prefetch=0,
            grid=grid,
            in_specs=[
                pl.BlockSpec((tb, dim), lambda i: (i, 0)),   # x batch tile
                pl.BlockSpec(w1.shape, const),
                pl.BlockSpec(b1.shape, const),
                pl.BlockSpec(w2.shape, const),
                pl.BlockSpec(b2.shape, const),
                pl.BlockSpec(w4.shape, const),
                pl.BlockSpec(b4.shape, const),
            ],
            out_specs=pl.BlockSpec((tb, num_layers), lambda i: (i, 0)),
        ),
        compiler_params=pltpu.CompilerParams(
            dimension_semantics=("parallel",),
        ),
        cost_estimate=pl.CostEstimate(
            flops=flops, transcendentals=0, bytes_accessed=bytes_accessed
        ),
    )(x, w1, b1, w2, b2, w4, b4)

    return {"policy": out}


def init_params(key, dim, num_layers):
    """Parameter init mirroring the PyTorch module's shapes.

    Raw Linear weights are stored pre-transposed as (in, out). BatchNorm eval
    statistics are folded once into the adjacent Linear weights here (not per call).
    Hidden layer 2 is zero-padded 64 -> 128 output lanes (and fc4 input rows to
    match) so h2 is lane-dense and the third matmul has K=128. Folded weights are
    stored in bf16; biases stay f32 (they add onto the f32 accumulator).
    """
    ks = jax.random.split(key, 16)

    def lin(kw, kb, fan_in, fan_out):
        bound = 1.0 / jnp.sqrt(jnp.float32(fan_in))
        w = jax.random.uniform(kw, (fan_in, fan_out), jnp.float32, -bound, bound)
        b = jax.random.uniform(kb, (1, fan_out), jnp.float32, -bound, bound)
        return w, b

    w1, b1 = lin(ks[0], ks[1], dim, H1)
    w2, b2 = lin(ks[2], ks[3], H1, H2)
    w4, b4 = lin(ks[4], ks[5], H2, num_layers)

    def bn(kg, kb, km, kv, c):
        g = 1.0 + 0.1 * jax.random.normal(kg, (1, c), jnp.float32)
        be = 0.1 * jax.random.normal(kb, (1, c), jnp.float32)
        m = 0.1 * jax.random.normal(km, (1, c), jnp.float32)
        v = 1.0 + 0.1 * jax.random.uniform(kv, (1, c), jnp.float32)
        return g, be, m, v

    g1, be1, m1, v1 = bn(ks[6], ks[7], ks[8], ks[9], H1)
    g2, be2, m2, v2 = bn(ks[10], ks[11], ks[12], ks[13], H2)
    # note: the third norm (32 channels) in the PyTorch module is unused in forward.

    # ---- fold BN (eval) into the linears (computed in f32, then cast) ----
    s1 = g1 * jax.lax.rsqrt(v1 + BN_EPS)                 # (1, 128)
    w1f = (w1 * s1).astype(jnp.bfloat16)                 # scale output columns
    b1f = (b1 - m1) * s1 + be1                           # f32

    s2 = g2 * jax.lax.rsqrt(v2 + BN_EPS)                 # (1, 64)
    w2f64 = w2 * s2
    b2f64 = (b2 - m2) * s2 + be2

    # ---- pad hidden-2 to lane-dense 128 columns; pad fc4 input rows to match ----
    w2f = jnp.zeros((H1, H2P), jnp.float32).at[:, :H2].set(w2f64).astype(jnp.bfloat16)
    b2f = jnp.zeros((1, H2P), jnp.float32).at[:, :H2].set(b2f64)
    w4p = jnp.zeros((H2P, num_layers), jnp.float32).at[:H2, :].set(w4).astype(jnp.bfloat16)
    b4f = b4                                              # (1, num_layers) f32

    return dict(
        # folded / padded params used by the kernel
        w1f=w1f, b1f=b1f, w2f=w2f, b2f=b2f, w4p=w4p, b4f=b4f,
        # raw params kept only for the pure-JAX reference check
        raw_w1=w1, raw_b1=b1, g1=g1, be1=be1, m1=m1, v1=v1,
        raw_w2=w2, raw_b2=b2, g2=g2, be2=be2, m2=m2, v2=v2,
        raw_w4=w4, raw_b4=b4,
    )


def _reference_forward(x, p):
    """Pure-JAX f32 reference using the *unfolded* parameters (eval-mode BN)."""
    h1 = x @ p["raw_w1"] + p["raw_b1"]
    h1 = (h1 - p["m1"]) / jnp.sqrt(p["v1"] + BN_EPS) * p["g1"] + p["be1"]
    h1 = jnp.maximum(h1, 0.0)
    h2 = h1 @ p["raw_w2"] + p["raw_b2"]
    h2 = (h2 - p["m2"]) / jnp.sqrt(p["v2"] + BN_EPS) * p["g2"] + p["be2"]
    h2 = jnp.maximum(h2, 0.0)
    return h2 @ p["raw_w4"] + p["raw_b4"]


if __name__ == "__main__":
    key = jax.random.PRNGKey(0)
    k_x, k_p = jax.random.split(key)

    B, dim, num_layers = 8, 32, 8
    x = jax.random.normal(k_x, (B, dim), jnp.float32)
    params = init_params(k_p, dim, num_layers)

    fwd = jax.jit(functools.partial(single_policy_net_forward, block_b=2048))
    out = fwd(x, params)
    policy = jax.block_until_ready(out["policy"])

    ref = _reference_forward(x, params)
    assert policy.shape == (B, num_layers)
    # bf16 operands -> loosened tolerance vs. the f32 reference.
    assert jnp.allclose(policy, ref, atol=5e-2, rtol=5e-2), float(
        jnp.max(jnp.abs(policy - ref))
    )

    print("KERNEL_OK")
</pallas_src>

<mosaic_0001>
module attributes {stable_mosaic.version = 11 : i64} {
  func.func @_policy_kernel(%arg0: i32, %arg1: memref<8x32xbf16, #tpu.memory_space<vmem>>, %arg2: memref<32x128xbf16, #tpu.memory_space<vmem>>, %arg3: memref<1x128xf32, #tpu.memory_space<vmem>>, %arg4: memref<128x128xbf16, #tpu.memory_space<vmem>>, %arg5: memref<1x128xf32, #tpu.memory_space<vmem>>, %arg6: memref<128x8xbf16, #tpu.memory_space<vmem>>, %arg7: memref<1x8xf32, #tpu.memory_space<vmem>>, %arg8: memref<8x8xf32, #tpu.memory_space<vmem>>) attributes {dimension_semantics = [#tpu.dimension_semantics<parallel>], iteration_bounds = array<i64: 1>, scalar_prefetch = 0 : i64, scratch_operands = 0 : i64, tpu.core_type = #tpu.core_type<tc>, window_params = [{transform_indices = @transform_0, window_bounds = array<i64: 8, 32>}, {pipeline_mode = #tpu.pipeline_mode<synchronous>, transform_indices = @transform_1, window_bounds = array<i64: 32, 128>}, {pipeline_mode = #tpu.pipeline_mode<synchronous>, transform_indices = @transform_2, window_bounds = array<i64: 1, 128>}, {pipeline_mode = #tpu.pipeline_mode<synchronous>, transform_indices = @transform_3, window_bounds = array<i64: 128, 128>}, {pipeline_mode = #tpu.pipeline_mode<synchronous>, transform_indices = @transform_4, window_bounds = array<i64: 1, 128>}, {pipeline_mode = #tpu.pipeline_mode<synchronous>, transform_indices = @transform_5, window_bounds = array<i64: 128, 8>}, {pipeline_mode = #tpu.pipeline_mode<synchronous>, transform_indices = @transform_6, window_bounds = array<i64: 1, 8>}, {transform_indices = @transform_7, window_bounds = array<i64: 8, 8>}]} {
    %c0 = arith.constant 0 : index
    %c0_0 = arith.constant 0 : index
    %0 = vector.load %arg1[%c0, %c0_0] : memref<8x32xbf16, #tpu.memory_space<vmem>>, vector<8x32xbf16>
    %c0_1 = arith.constant 0 : index
    %c0_2 = arith.constant 0 : index
    %1 = vector.load %arg2[%c0_1, %c0_2] : memref<32x128xbf16, #tpu.memory_space<vmem>>, vector<32x128xbf16>
    %cst = arith.constant dense<0.000000e+00> : vector<8x128xf32>
    %2 = tpu.matmul %0, %1, %cst {dimension_numbers = #tpu.dot_dimension_numbers<[1], [0], [0], [1], [0, 0, 1, 1], [], []>} : vector<8x32xbf16>, vector<32x128xbf16>, vector<8x128xf32> -> vector<8x128xf32>
    %c0_3 = arith.constant 0 : index
    %c0_4 = arith.constant 0 : index
    %3 = vector.load %arg3[%c0_3, %c0_4] : memref<1x128xf32, #tpu.memory_space<vmem>>, vector<1x128xf32>
    %4 = vector.broadcast %3 : vector<1x128xf32> to vector<8x128xf32>
    %5 = arith.addf %2, %4 : vector<8x128xf32>
    %cst_5 = arith.constant 0.000000e+00 : f32
    %6 = vector.broadcast %cst_5 : f32 to vector<8x128xf32>
    %7 = arith.maximumf %5, %6 : vector<8x128xf32>
    %8 = arith.truncf %7 : vector<8x128xf32> to vector<8x128xbf16>
    %c0_6 = arith.constant 0 : index
    %c0_7 = arith.constant 0 : index
    %9 = vector.load %arg4[%c0_6, %c0_7] : memref<128x128xbf16, #tpu.memory_space<vmem>>, vector<128x128xbf16>
    %cst_8 = arith.constant dense<0.000000e+00> : vector<8x128xf32>
    %10 = tpu.matmul %8, %9, %cst_8 {dimension_numbers = #tpu.dot_dimension_numbers<[1], [0], [0], [1], [0, 0, 1, 1], [], []>} : vector<8x128xbf16>, vector<128x128xbf16>, vector<8x128xf32> -> vector<8x128xf32>
    %c0_9 = arith.constant 0 : index
    %c0_10 = arith.constant 0 : index
    %11 = vector.load %arg5[%c0_9, %c0_10] : memref<1x128xf32, #tpu.memory_space<vmem>>, vector<1x128xf32>
    %12 = vector.broadcast %11 : vector<1x128xf32> to vector<8x128xf32>
    %13 = arith.addf %10, %12 : vector<8x128xf32>
    %cst_11 = arith.constant 0.000000e+00 : f32
    %14 = vector.broadcast %cst_11 : f32 to vector<8x128xf32>
    %15 = arith.maximumf %13, %14 : vector<8x128xf32>
    %16 = arith.truncf %15 : vector<8x128xf32> to vector<8x128xbf16>
    %c0_12 = arith.constant 0 : index
    %c0_13 = arith.constant 0 : index
    %17 = vector.load %arg6[%c0_12, %c0_13] : memref<128x8xbf16, #tpu.memory_space<vmem>>, vector<128x8xbf16>
    %cst_14 = arith.constant dense<0.000000e+00> : vector<8x8xf32>
    %18 = tpu.matmul %16, %17, %cst_14 {dimension_numbers = #tpu.dot_dimension_numbers<[1], [0], [0], [1], [0, 0, 1, 1], [], []>} : vector<8x128xbf16>, vector<128x8xbf16>, vector<8x8xf32> -> vector<8x8xf32>
    %c0_15 = arith.constant 0 : index
    %c0_16 = arith.constant 0 : index
    %19 = vector.load %arg7[%c0_15, %c0_16] : memref<1x8xf32, #tpu.memory_space<vmem>>, vector<1x8xf32>
    %20 = vector.broadcast %19 : vector<1x8xf32> to vector<8x8xf32>
    %21 = arith.addf %18, %20 : vector<8x8xf32>
    %c0_17 = arith.constant 0 : index
    %c0_18 = arith.constant 0 : index
    %22 = vector.load %arg8[%c0_17, %c0_18] : memref<8x8xf32, #tpu.memory_space<vmem>>, vector<8x8xf32>
    tpu.vector_store %arg8[%c0_17, %c0_18], %21 {strides = array<i32>} : memref<8x8xf32, #tpu.memory_space<vmem>>, vector<8x8xf32>,
    return
  }
  func.func @transform_0(%arg0: i32) -> (i32, i32) {
    %c0_i32 = arith.constant 0 : i32
    %c0_i32_0 = arith.constant 0 : i32
    return %arg0, %c0_i32 : i32, i32
  }
  func.func @transform_1(%arg0: i32) -> (i32, i32) {
    %c0_i32 = arith.constant 0 : i32
    %c0_i32_0 = arith.constant 0 : i32
    %c0_i32_1 = arith.constant 0 : i32
    return %c0_i32, %c0_i32_0 : i32, i32
  }
  func.func @transform_2(%arg0: i32) -> (i32, i32) {
    %c0_i32 = arith.constant 0 : i32
    %c0_i32_0 = arith.constant 0 : i32
    %c0_i32_1 = arith.constant 0 : i32
    return %c0_i32, %c0_i32_0 : i32, i32
  }
  func.func @transform_3(%arg0: i32) -> (i32, i32) {
    %c0_i32 = arith.constant 0 : i32
    %c0_i32_0 = arith.constant 0 : i32
    %c0_i32_1 = arith.constant 0 : i32
    return %c0_i32, %c0_i32_0 : i32, i32
  }
  func.func @transform_4(%arg0: i32) -> (i32, i32) {
    %c0_i32 = arith.constant 0 : i32
    %c0_i32_0 = arith.constant 0 : i32
    %c0_i32_1 = arith.constant 0 : i32
    return %c0_i32, %c0_i32_0 : i32, i32
  }
  func.func @transform_5(%arg0: i32) -> (i32, i32) {
    %c0_i32 = arith.constant 0 : i32
    %c0_i32_0 = arith.constant 0 : i32
    %c0_i32_1 = arith.constant 0 : i32
    return %c0_i32, %c0_i32_0 : i32, i32
  }
  func.func @transform_6(%arg0: i32) -> (i32, i32) {
    %c0_i32 = arith.constant 0 : i32
    %c0_i32_0 = arith.constant 0 : i32
    %c0_i32_1 = arith.constant 0 : i32
    return %c0_i32, %c0_i32_0 : i32, i32
  }
  func.func @transform_7(%arg0: i32) -> (i32, i32) {
    %c0_i32 = arith.constant 0 : i32
    %c0_i32_0 = arith.constant 0 : i32
    return %arg0, %c0_i32 : i32, i32
  }
}

</mosaic_0001>

<bundles_post_ra>
// kernel: single_policy_net_forward.1
= control target key start
LH: loop header
LB: loop body
LE: loop exit
PB: predicated region body
PF: predicated region fallthrough
CT: control target
= control target key end

     0   :  { %v472_v1 = vmov 0.0   ;;  %vm473_vm0 = vmmov 0   ;;  %vm52_vm1 = vcmask 261120   ;;  %s608_s0 = inlined_call_operand.vmem [shape: bf16[8,32], index: 0, kind: input, shape index: {}]   ;;  %s609_s1 = inlined_call_operand.vmem [shape: bf16[32,128], index: 1, kind: input, shape index: {}]   ;;  %s610_s2 = inlined_call_operand.vmem [shape: f32[1,128], index: 2, kind: input, shape index: {}]   ;;  %s611_s3 = inlined_call_operand.vmem [shape: bf16[128,128], index: 3, kind: input, shape index: {}]   ;;  %s612_s4 = inlined_call_operand.vmem [shape: f32[1,128], index: 4, kind: input, shape index: {}]   ;;  %s613_s5 = inlined_call_operand.vmem [shape: bf16[128,8], index: 5, kind: input, shape index: {}]   ;;  %s614_s6 = inlined_call_operand.vmem [shape: f32[1,8], index: 6, kind: input, shape index: {}]   ;;  %s615_s7 = inlined_call_operand.hbm [shape: f32[8,8], index: 7, kind: output, shape index: {}]  }
   0x1   :  { %v432_v0 = vld [vmem:[%s609_s1 + $0x8] sm:$0xff]   ;;  %381 = vmatprep.subr.bf16.mxu0 %v472_v1  ;;  %389 = vmatprep.subr.bf16.mxu1 %v472_v1  ;;  %v433_v2 = vld [vmem:[%s609_s1] sm:$0xff]   ;;  %v434_v3 = vld [vmem:[%s611_s3 + $0x38] sm:$0xff]  }
   0x2   :  { %382 = vmatpush3.bf16.msra.mxu0 %v432_v0  ;;  %385 = vmatprep.mubr.msk.bf16.mxu0 %vm473_vm0, %v472_v1  ;;  %v435_v4 = vld [vmem:[%s611_s3 + $0x30] sm:$0xff]   ;;  %v28_v5 = vld [vmem:[%s608_s0] sm:$0xf]  ;;  %v436_v6 = vld [vmem:[%s611_s3 + $0x28] sm:$0xff]  }
   0x3   :  { %383 = vmatprep.subr.bf16.mxu0 %v472_v1  ;;  %405 = vmatprep.mubr.msk.bf16.mxu1 %vm473_vm0, %v472_v1  ;;  %v437_v7 = vld [vmem:[%s611_s3 + $0x20] sm:$0xff]  }
   0x4   :  { %390 = vmatpush3.bf16.msra.mxu1 %v434_v3 }
   0x5   :  { %391 = vmatprep.subr.bf16.mxu1 %v472_v1 }
   0x6   :  { %384 = vmatpush3.bf16.msra.mxu0 %v433_v2 }
   0x7   :  { %409 = vmatprep.subr.bf16.mxu0 %v472_v1 }
   0x8   :  { %392 = vmatpush3.bf16.msra.mxu1 %v435_v4 }
   0x9   :  { %386 = vmatmul.mubr.msk.bf16.vlgmr.msra.gmra.mxu0 %vm52_vm1, %v28_v5  ;;  %393 = vmatprep.subr.bf16.mxu1 %v472_v1 }
   0xa   :  { %425 = vmatprep.mubr.msk.bf16.mxu0 %vm473_vm0, %v472_v1 }
   0xc   :  { %394 = vmatpush3.bf16.msra.mxu1 %v436_v6 }
   0xd   :  { %395 = vmatprep.subr.bf16.mxu1 %v472_v1 }
   0xe   :  { %12 = vsyncpa [#allocation3], 0  ;;  %v438_v8 = vld [vmem:[%s611_s3 + $0x18] sm:$0xff]   ;;  %v439_v9 = vld [vmem:[%s611_s3 + $0x10] sm:$0xff]   ;;  %s474_s16 = smov [#allocation2]   ;;  %vm322_vm2 = vcmask 64512  }
   0xf   :  { %v440_v10 = vld [vmem:[%s611_s3 + $0x8] sm:$0xff]   ;;  %v441_v11 = vld [vmem:[%s611_s3] sm:$0xff]   ;;  %v442_v12 = vld [vmem:[%s613_s5 + $0x38] sm:$0xff]   ;;  %s330_s17 = sshll.u32 %s474_s16, 4  ;;  %s331_s17 = int_to_ptr.vmem [resolvable:$true] %s330_s17 }
  0x10   :  { %396 = vmatpush3.bf16.msra.mxu1 %v437_v7  ;;  %410 = vmatpush3.bf16.msra.mxu0 %v442_v12  ;;  %v443_v13 = vld [vmem:[%s613_s5 + $0x30] sm:$0xff]   ;;  %v444_v14 = vld [vmem:[%s613_s5 + $0x28] sm:$0xff]   ;;  %v445_v15 = vld [vmem:[%s613_s5 + $0x20] sm:$0xff]   ;;  %p455_p1 = scmp.lt.s32.totalorder %s331_s17, %s331_s17 }
  0x11   :  { %397 = vmatprep.subr.bf16.mxu1 %v472_v1  ;;  %411 = vmatprep.subr.bf16.mxu0 %v472_v1  ;;  %v446_v16 = vld [vmem:[%s613_s5 + $0x18] sm:$0xff]   ;;  %v447_v17 = vld [vmem:[%s613_s5 + $0x10] sm:$0xff]   ;;  %v338_v18 = vld [vmem:[%s610_s2] ss:$0 sm:$0xff] }
  0x12   :  { %v448_v26 = vld [vmem:[%s613_s5 + $0x8] sm:$0xff]   ;;  %v449_v27 = vld [vmem:[%s613_s5] sm:$0xff]  }
  0x13   :  { %v342_v28 = vld [vmem:[%s612_s4] ss:$0 sm:$0xff]  ;;  %s450_s4 = scalar_lea.vmem %s331_s17, 128 }
  0x14   :  { %398 = vmatpush3.bf16.msra.mxu1 %v438_v8  ;;  %412 = vmatpush3.bf16.msra.mxu0 %v443_v13  ;;  %v351_v36 = vld [vmem:[%s614_s6] ss:$0 sm:$0xff]  ;;  %p451_p0 = scmp.ne.s32.totalorder %s331_s17, %s450_s4  ;;  %p456_p2 = scmp.lt.s32.totalorder %s450_s4, %s450_s4 }
  0x15   :  { %399 = vmatprep.subr.bf16.mxu1 %v472_v1  ;;  %413 = vmatprep.subr.bf16.mxu0 %v472_v1 }
  0x16   :  { %p457_p3 = por %p456_p2, %p455_p1 }
  0x18   :  { %400 = vmatpush3.bf16.msra.mxu1 %v439_v9  ;;  %414 = vmatpush3.bf16.msra.mxu0 %v444_v14  ;;  %p458_p4 = pnand %p457_p3, %p451_p0 }
  0x19   :  { %401 = vmatprep.subr.bf16.mxu1 %v472_v1  ;;  %415 = vmatprep.subr.bf16.mxu0 %v472_v1 }
  0x1c   :  { %402 = vmatpush3.bf16.msra.mxu1 %v440_v10  ;;  %416 = vmatpush3.bf16.msra.mxu0 %v445_v15 }
  0x1d   :  { %403 = vmatprep.subr.bf16.mxu1 %v472_v1  ;;  %417 = vmatprep.subr.bf16.mxu0 %v472_v1 }
  0x20   :  { %404 = vmatpush3.bf16.msra.mxu1 %v441_v11  ;;  %418 = vmatpush3.bf16.msra.mxu0 %v446_v16 }
  0x21   :  { %419 = vmatprep.subr.bf16.mxu0 %v472_v1 }
  0x24   :  { %420 = vmatpush3.bf16.msra.mxu0 %v447_v17 }
  0x25   :  { %421 = vmatprep.subr.bf16.mxu0 %v472_v1 }
  0x28   :  { %422 = vmatpush3.bf16.msra.mxu0 %v448_v26 }
  0x29   :  { %423 = vmatprep.subr.bf16.mxu0 %v472_v1 }
  0x2c   :  { %424 = vmatpush3.bf16.msra.mxu0 %v449_v27 }
  0xc9   :  { %v90_v19 = vpop.f32.mrf.mxu0 }
  0xca   :  { %v91_v20 = vadd.f32 %v338_v18, %v90_v19 }
  0xcb   :  { %v387_v21 = vpop.f32.mrf.mxu0 }
  0xcc   :  { %v96_v22 = vmax.f32 %v91_v20, 0.0 }
  0xcd   :  { %v93_v23 = vpop.f32.mrf.mxu0 }
  0xce   :  { %v97_v24 = vpack.c.bf16 %v96_v22, %v96_v22 }
  0xcf   :  { %v388_v25 = vpop.f32.mrf.mxu0 }
  0xd0   :  { %406 = vmatmul.mubr.bf16.vlgmr.msra.gmra.mxu1 %v97_v24 }
 0x190   :  { %v203_v29 = vpop.f32.mrf.mxu1 }
 0x191   :  { %v204_v30 = vadd.f32 %v342_v28, %v203_v29 }
 0x192   :  { %v407_v31 = vpop.f32.mrf.mxu1 }
 0x193   :  { %v209_v32 = vmax.f32 %v204_v30, 0.0 }
 0x194   :  { %v206_v33 = vpop.f32.mrf.mxu1 }
 0x195   :  { %v210_v34 = vpack.c.bf16 %v209_v32, %v209_v32 }
 0x196   :  { %v408_v35 = vpop.f32.mrf.mxu1 }
 0x197   :  { %426 = vmatmul.mubr.bf16.vlgmr.msra.gmra.mxu0 %v210_v34 }
 0x257   :  { %v316_v37 = vpop.f32.mrf.mxu0 }
 0x258   :  { %v317_v38 = vadd.f32 %v351_v36, %v316_v37 }
 0x259   :  { %v427_v39 = vpop.f32.mrf.mxu0 }
 0x25a   :  { %323 = vst.msk [vmem:[#allocation2] sm:$0xff] %vm322_vm2, %v317_v38 }
 0x25b   :  { %v319_v40 = vpop.f32.mrf.mxu0 }
 0x25c   :  { %461 = shalt.err (!%p458_p4)
}
 0x25d   :  { %333 = dma.vmem_to_hbm [thread:$0]  %s331_s17, 128, %s615_s7, [#allocation3]   ;;  %v428_v41 = vpop.f32.mrf.mxu0 }
 0x25e   :  { %470 = dma.done.wait [#allocation3], 128  }
 0x25f   :  { %471 = vsyncadd [#allocation3], 4294967168 }
 0x260   :  { %337 = vsyncpa [#allocation3], 1 }

</bundles_post_ra>
